<compile_context>
chip_gen: v6e
topology: v6e:2x2x1
jax: 0.10.0
libtpu: 0.0.40
codegen_flags: <defaults>
</compile_context>

<pallas_src>
import functools

import numpy as np

import jax
import jax.numpy as jnp
from jax.experimental import pallas as pl
from jax.experimental.pallas import tpu as pltpu

_BN_EPS = 1e-5
_LEAKY_SLOPE = 0.2
_LANES = 128
_SUBLANES = 8
_REF_PRECISION = jax.lax.Precision.HIGHEST


def _round_up(x, m):
    return (x + m - 1) // m * m


# --------------------------- host-side weight packing -------------------------
class _SlabPacker:
    """Packs small 2-D weight pieces into one (rows, 128) f32 slab.

    Each piece starts at an 8-row-aligned offset and at lane 0, so every
    in-kernel access is a static, tile-friendly ref window.
    """

    def __init__(self):
        self._rows = 0
        self._pieces = []
        self.offsets = {}            # name -> (row_offset, nrows, ncols)

    def add(self, name, arr):
        arr = np.asarray(arr, np.float32)
        if arr.ndim == 1:
            arr = arr[None, :]
        r, c = arr.shape
        assert c <= _LANES, (name, arr.shape)
        off = self._rows
        self.offsets[name] = (off, r, c)
        self._pieces.append((off, arr))
        self._rows = off + _round_up(r, _SUBLANES)

    def finalize(self):
        total = _round_up(self._rows, _SUBLANES)
        slab = np.zeros((total, _LANES), np.float32)
        for off, arr in self._pieces:
            slab[off:off + arr.shape[0], :arr.shape[1]] = arr
        return jnp.asarray(slab)


def _big_conv_weight(w, l_in):
    """(Cin, Cout, 4) ConvTranspose1d(k=4,s=2,p=1) weight -> block-banded
    (l_in*Cin, 2*l_in*Cout) matrix acting on position-major lanes.

    out[2j]   = x[j] @ W[:,:,1] + x[j-1] @ W[:,:,3]
    out[2j+1] = x[j] @ W[:,:,2] + x[j+1] @ W[:,:,0]
    """
    w = np.asarray(w, np.float32)
    cin, cout, _ = w.shape
    big = np.zeros((l_in * cin, 2 * l_in * cout), np.float32)
    for j in range(l_in):
        rows = slice(j * cin, (j + 1) * cin)
        big[rows, (2 * j) * cout:(2 * j + 1) * cout] += w[:, :, 1]        # -> out[2j]
        big[rows, (2 * j + 1) * cout:(2 * j + 2) * cout] += w[:, :, 2]    # -> out[2j+1]
        if j + 1 <= l_in - 1:
            big[rows, (2 * j + 2) * cout:(2 * j + 3) * cout] += w[:, :, 3]  # -> out[2j+2]
        if j >= 1:
            big[rows, (2 * j - 1) * cout:(2 * j) * cout] += w[:, :, 0]      # -> out[2j-1]
    return big


def _pool_matrix(l_in, cin):
    """0/1 (l_in*cin, l_in*cin) matrix: sums each channel over the l_in positions
    and re-broadcasts the per-channel total across positions."""
    return np.tile(np.eye(cin, dtype=np.float32), (l_in, l_in))


def _pack_generator_params(params, *, noise_dim, base_channels,
                           final_window_length, time_series_dims):
    l0 = final_window_length // 8
    c0 = base_channels
    chans = [c0, c0 // 2, c0 // 4, time_series_dims]
    packer = _SlabPacker()

    # fc: permute output features from torch's (channel, position) ordering to
    # position-major (position, channel) so the fc output is already in the
    # kernel's activation layout.
    fc_w = np.asarray(params["fc_w"], np.float32)          # col = c*l0 + m
    fc_w = fc_w.reshape(noise_dim, c0, l0).transpose(0, 2, 1).reshape(noise_dim, l0 * c0)
    fc_b = np.asarray(params["fc_b"], np.float32).reshape(c0, l0).T.reshape(-1)
    packer.add("fc_w", fc_w)
    packer.add("fc_b", fc_b)

    stages = []
    l_in = l0
    for s in range(3):
        cin, cout = chans[s], chans[s + 1]
        packer.add(f"g{s}", np.tile(np.asarray(params[f"bn{s + 1}_g"], np.float32), l_in))
        packer.add(f"b{s}", np.tile(np.asarray(params[f"bn{s + 1}_b"], np.float32), l_in))
        packer.add(f"pool{s}", _pool_matrix(l_in, cin))
        packer.add(f"w{s}", _big_conv_weight(params[f"ct{s + 1}_w"], l_in))
        packer.add(f"cb{s}", np.tile(np.asarray(params[f"ct{s + 1}_b"], np.float32), 2 * l_in))
        stages.append(dict(l_in=l_in, cin=cin, cout=cout, sigmoid=(s == 2)))
        l_in *= 2

    return packer.finalize(), packer.offsets, tuple(stages)


# ------------------------------ fused kernel ----------------------------------
def _acgan_generator_kernel(noise_ref, slab_ref, out_ref, *, offsets, stages, batch):
    def piece(name):
        off, r, c = offsets[name]
        return slab_ref[off:off + r, 0:c]          # static window -> cheap load

    rows = noise_ref.shape[0]                      # padded batch (multiple of 8)
    row_ids = jax.lax.broadcasted_iota(jnp.int32, (rows, 1), 0)
    valid = row_ids < batch                        # pad rows excluded from BN stats

    # fc: lanes ordered position-major (lane = m*C0 + c) -> no reshape needed.
    x = (jnp.dot(noise_ref[...], piece("fc_w"), preferred_element_type=jnp.float32)
         + piece("fc_b"))

    for s, st in enumerate(stages):
        l_in = st["l_in"]
        inv_count = 1.0 / float(batch * l_in)

        # ---- BatchNorm1d (training-mode batch stats), single pass ------------
        xm = jnp.where(valid, x, 0.0)
        s1 = jnp.sum(xm, axis=0, keepdims=True)
        s2 = jnp.sum(xm * xm, axis=0, keepdims=True)
        # Pool per-channel sums across positions and re-broadcast: one tiny matmul.
        s1 = jnp.dot(s1, piece(f"pool{s}"), preferred_element_type=jnp.float32)
        s2 = jnp.dot(s2, piece(f"pool{s}"), preferred_element_type=jnp.float32)
        mean = s1 * inv_count
        var = s2 * inv_count - mean * mean
        scale = piece(f"g{s}") * jax.lax.rsqrt(var + _BN_EPS)
        shift = piece(f"b{s}") - mean * scale
        a = x * scale + shift
        a = jnp.where(a >= 0.0, a, _LEAKY_SLOPE * a)          # LeakyReLU(0.2)

        # ---- ConvTranspose1d(k=4, s=2, p=1): one block-banded matmul ---------
        y = (jnp.dot(a, piece(f"w{s}"), preferred_element_type=jnp.float32)
             + piece(f"cb{s}"))
        if st["sigmoid"]:
            y = jax.nn.sigmoid(y)
        x = y

    # Single lane-contiguous store; lanes are (position, dim) so the host
    # un-permute is just a reshape.
    out_ref[...] = x[:out_ref.shape[0], :]


# ------------------------------ host wrapper ----------------------------------
def build_generator_forward(params, *, noise_dim, base_channels,
                            final_window_length, time_series_dims):
    """Returns forward(noise, context_vars=None) -> ((B, seq_len, D), {})."""
    seq_len = final_window_length
    d = time_series_dims
    slab, offsets, stages = _pack_generator_params(
        params, noise_dim=noise_dim, base_channels=base_channels,
        final_window_length=final_window_length, time_series_dims=time_series_dims)

    vmem = pl.BlockSpec(memory_space=pltpu.MemorySpace.VMEM)

    @jax.jit
    def _impl(noise, slab_arr):
        batch = noise.shape[0]
        rows = _round_up(max(batch, _SUBLANES), _SUBLANES)
        if rows != batch:
            noise = jnp.concatenate(
                [noise, jnp.zeros((rows - batch, noise.shape[1]), noise.dtype)], axis=0)
        kernel = functools.partial(_acgan_generator_kernel,
                                   offsets=offsets, stages=stages, batch=batch)
        out2d = pl.pallas_call(
            kernel,
            out_shape=jax.ShapeDtypeStruct((batch, seq_len * d), jnp.float32),
            in_specs=[vmem, vmem],
            out_specs=vmem,
        )(noise, slab_arr)
        return out2d.reshape(batch, seq_len, d)      # free: lanes already (pos, dim)

    def forward(noise, context_vars=None):
        # TODO(synk): context_module embedding / classification-logits path not translated.
        assert context_vars is None
        return _impl(noise, slab), {}

    return forward


# -------------------------- pure-JAX reference --------------------------------
def _conv_transpose1d_ref(x, w, b):
    # x: (B, Cin, L) NCL ; w: (Cin, Cout, K) ; stride=2, padding=1
    batch, _, length = x.shape
    k_sz = w.shape[2]
    full = jnp.zeros((batch, w.shape[1], (length - 1) * 2 + k_sz), jnp.float32)
    for k in range(k_sz):
        contrib = jnp.einsum("bcl,cd->bdl", x, w[:, :, k], precision=_REF_PRECISION)
        full = full.at[:, :, k:k + 2 * length:2].add(contrib)
    return full[:, :, 1:1 + 2 * length] + b[None, :, None]


def reference_forward(noise, p, base_channels, final_window_length):
    l0 = final_window_length // 8
    batch = noise.shape[0]
    x = jnp.dot(noise, p["fc_w"], precision=_REF_PRECISION) + p["fc_b"]
    x = x.reshape(batch, base_channels, l0)                     # NCL like torch
    stages = [
        (p["bn1_g"], p["bn1_b"], p["ct1_w"], p["ct1_b"], False),
        (p["bn2_g"], p["bn2_b"], p["ct2_w"], p["ct2_b"], False),
        (p["bn3_g"], p["bn3_b"], p["ct3_w"], p["ct3_b"], True),
    ]
    for g, be, w, b, sig in stages:
        mean = jnp.mean(x, axis=(0, 2), keepdims=True)
        var = jnp.mean(jnp.square(x - mean), axis=(0, 2), keepdims=True)
        xh = (x - mean) / jnp.sqrt(var + _BN_EPS)
        xh = xh * g[None, :, None] + be[None, :, None]
        xh = jnp.where(xh >= 0, xh, _LEAKY_SLOPE * xh)
        x = _conv_transpose1d_ref(xh, w, b)
        if sig:
            x = jax.nn.sigmoid(x)
    return jnp.transpose(x, (0, 2, 1))                          # (B, L, D)


# --------------------------------- main ----------------------------------------
if __name__ == "__main__":
    NOISE_DIM = 8
    FINAL_WINDOW_LENGTH = 16          # -> L0 = 2, output seq_len = 16
    TIME_SERIES_DIMS = 3
    BASE_CHANNELS = 32
    BATCH = 2
    L0 = FINAL_WINDOW_LENGTH // 8

    key = jax.random.PRNGKey(0)
    ks = jax.random.split(key, 16)
    n = jax.random.normal

    params = {
        "fc_w": 0.1 * n(ks[0], (NOISE_DIM, L0 * BASE_CHANNELS), jnp.float32),
        "fc_b": 0.1 * n(ks[1], (L0 * BASE_CHANNELS,), jnp.float32),
        "bn1_g": 1.0 + 0.1 * n(ks[2], (BASE_CHANNELS,), jnp.float32),
        "bn1_b": 0.1 * n(ks[3], (BASE_CHANNELS,), jnp.float32),
        "ct1_w": 0.2 * n(ks[4], (BASE_CHANNELS, BASE_CHANNELS // 2, 4), jnp.float32),
        "ct1_b": 0.1 * n(ks[5], (BASE_CHANNELS // 2,), jnp.float32),
        "bn2_g": 1.0 + 0.1 * n(ks[6], (BASE_CHANNELS // 2,), jnp.float32),
        "bn2_b": 0.1 * n(ks[7], (BASE_CHANNELS // 2,), jnp.float32),
        "ct2_w": 0.2 * n(ks[8], (BASE_CHANNELS // 2, BASE_CHANNELS // 4, 4), jnp.float32),
        "ct2_b": 0.1 * n(ks[9], (BASE_CHANNELS // 4,), jnp.float32),
        "bn3_g": 1.0 + 0.1 * n(ks[10], (BASE_CHANNELS // 4,), jnp.float32),
        "bn3_b": 0.1 * n(ks[11], (BASE_CHANNELS // 4,), jnp.float32),
        "ct3_w": 0.2 * n(ks[12], (BASE_CHANNELS // 4, TIME_SERIES_DIMS, 4), jnp.float32),
        "ct3_b": 0.1 * n(ks[13], (TIME_SERIES_DIMS,), jnp.float32),
    }
    noise = jax.random.normal(ks[14], (BATCH, NOISE_DIM), jnp.float32)

    generator_forward = build_generator_forward(
        params, noise_dim=NOISE_DIM, base_channels=BASE_CHANNELS,
        final_window_length=FINAL_WINDOW_LENGTH, time_series_dims=TIME_SERIES_DIMS)

    out, logits = generator_forward(noise)
    out = jax.block_until_ready(out)

    assert out.shape == (BATCH, FINAL_WINDOW_LENGTH, TIME_SERIES_DIMS)
    assert logits == {}

    ref = reference_forward(noise, params, BASE_CHANNELS, FINAL_WINDOW_LENGTH)
    ref = jax.block_until_ready(ref)
    max_err = float(jnp.max(jnp.abs(out - ref)))
    # Kernel uses default MXU precision (per perf review); reference is f32-HIGHEST.
    assert jnp.allclose(out, ref, atol=2e-2, rtol=2e-2), max_err

    print("KERNEL_OK")
</pallas_src>

<mosaic_0001>
module attributes {stable_mosaic.version = 11 : i64} {
  func.func @_acgan_generator_kernel(%arg0: memref<8x8xf32, #tpu.memory_space<vmem>>, %arg1: memref<472x128xf32, #tpu.memory_space<vmem>>, %arg2: memref<2x48xf32, #tpu.memory_space<vmem>>) attributes {dimension_semantics = [], scalar_prefetch = 0 : i64, scratch_operands = 0 : i64, tpu.core_type = #tpu.core_type<tc>} {
    %0 = tpu.iota {dimensions = array<i32: 0>} : vector<8x1xi32>
    %c2_i32 = arith.constant 2 : i32
    %1 = vector.broadcast %c2_i32 : i32 to vector<8x1xi32>
    %2 = arith.cmpi slt, %0, %1 : vector<8x1xi32>
    %c0 = arith.constant 0 : index
    %c0_0 = arith.constant 0 : index
    %3 = vector.load %arg0[%c0, %c0_0] : memref<8x8xf32, #tpu.memory_space<vmem>>, vector<8x8xf32>
    %c0_1 = arith.constant 0 : index
    %c0_2 = arith.constant 0 : index
    %4 = vector.load %arg1[%c0_1, %c0_2] : memref<472x128xf32, #tpu.memory_space<vmem>>, vector<8x64xf32>
    %cst = arith.constant dense<0.000000e+00> : vector<8x64xf32>
    %5 = tpu.matmul %3, %4, %cst {dimension_numbers = #tpu.dot_dimension_numbers<[1], [0], [0], [1], [0, 0, 1, 1], [], []>} : vector<8x8xf32>, vector<8x64xf32>, vector<8x64xf32> -> vector<8x64xf32>
    %c8 = arith.constant 8 : index
    %c0_3 = arith.constant 0 : index
    %6 = vector.load %arg1[%c8, %c0_3] : memref<472x128xf32, #tpu.memory_space<vmem>>, vector<1x64xf32>
    %7 = vector.broadcast %6 : vector<1x64xf32> to vector<8x64xf32>
    %8 = arith.addf %5, %7 : vector<8x64xf32>
    %cst_4 = arith.constant 0.000000e+00 : f32
    %9 = vector.shape_cast %2 : vector<8x1xi1> to vector<8x1xi1>
    %10 = vector.broadcast %9 : vector<8x1xi1> to vector<8x64xi1>
    %11 = vector.broadcast %cst_4 : f32 to vector<8x64xf32>
    %12 = arith.select %10, %8, %11 : vector<8x64xi1>, vector<8x64xf32>
    %cst_5 = arith.constant dense<0.000000e+00> : vector<64xf32>
    %13 = vector.multi_reduction <add>, %12, %cst_5 [0] : vector<8x64xf32> to vector<64xf32>
    %14 = vector.shape_cast %13 : vector<64xf32> to vector<1x64xf32>
    %15 = arith.mulf %12, %12 : vector<8x64xf32>
    %cst_6 = arith.constant dense<0.000000e+00> : vector<64xf32>
    %16 = vector.multi_reduction <add>, %15, %cst_6 [0] : vector<8x64xf32> to vector<64xf32>
    %17 = vector.shape_cast %16 : vector<64xf32> to vector<1x64xf32>
    %c32 = arith.constant 32 : index
    %c0_7 = arith.constant 0 : index
    %18 = vector.load %arg1[%c32, %c0_7] : memref<472x128xf32, #tpu.memory_space<vmem>>, vector<64x64xf32>
    %cst_8 = arith.constant dense<0.000000e+00> : vector<1x64xf32>
    %19 = tpu.matmul %14, %18, %cst_8 {dimension_numbers = #tpu.dot_dimension_numbers<[1], [0], [0], [1], [0, 0, 1, 1], [], []>} : vector<1x64xf32>, vector<64x64xf32>, vector<1x64xf32> -> vector<1x64xf32>
    %c32_9 = arith.constant 32 : index
    %c0_10 = arith.constant 0 : index
    %20 = vector.load %arg1[%c32_9, %c0_10] : memref<472x128xf32, #tpu.memory_space<vmem>>, vector<64x64xf32>
    %cst_11 = arith.constant dense<0.000000e+00> : vector<1x64xf32>
    %21 = tpu.matmul %17, %20, %cst_11 {dimension_numbers = #tpu.dot_dimension_numbers<[1], [0], [0], [1], [0, 0, 1, 1], [], []>} : vector<1x64xf32>, vector<64x64xf32>, vector<1x64xf32> -> vector<1x64xf32>
    %cst_12 = arith.constant 2.500000e-01 : f32
    %22 = vector.broadcast %cst_12 : f32 to vector<1x64xf32>
    %23 = arith.mulf %19, %22 : vector<1x64xf32>
    %cst_13 = arith.constant 2.500000e-01 : f32
    %24 = vector.broadcast %cst_13 : f32 to vector<1x64xf32>
    %25 = arith.mulf %21, %24 : vector<1x64xf32>
    %26 = arith.mulf %23, %23 : vector<1x64xf32>
    %27 = arith.subf %25, %26 : vector<1x64xf32>
    %c16 = arith.constant 16 : index
    %c0_14 = arith.constant 0 : index
    %28 = vector.load %arg1[%c16, %c0_14] : memref<472x128xf32, #tpu.memory_space<vmem>>, vector<1x64xf32>
    %cst_15 = arith.constant 9.99999974E-6 : f32
    %29 = vector.broadcast %cst_15 : f32 to vector<1x64xf32>
    %30 = arith.addf %27, %29 : vector<1x64xf32>
    %31 = math.rsqrt %30 : vector<1x64xf32>
    %32 = arith.mulf %28, %31 : vector<1x64xf32>
    %c24 = arith.constant 24 : index
    %c0_16 = arith.constant 0 : index
    %33 = vector.load %arg1[%c24, %c0_16] : memref<472x128xf32, #tpu.memory_space<vmem>>, vector<1x64xf32>
    %34 = arith.mulf %23, %32 : vector<1x64xf32>
    %35 = arith.subf %33, %34 : vector<1x64xf32>
    %36 = vector.broadcast %32 : vector<1x64xf32> to vector<8x64xf32>
    %37 = arith.mulf %8, %36 : vector<8x64xf32>
    %38 = vector.broadcast %35 : vector<1x64xf32> to vector<8x64xf32>
    %39 = arith.addf %37, %38 : vector<8x64xf32>
    %cst_17 = arith.constant 0.000000e+00 : f32
    %40 = vector.broadcast %cst_17 : f32 to vector<8x64xf32>
    %41 = arith.cmpf oge, %39, %40 : vector<8x64xf32>
    %cst_18 = arith.constant 2.000000e-01 : f32
    %42 = vector.broadcast %cst_18 : f32 to vector<8x64xf32>
    %43 = arith.mulf %42, %39 : vector<8x64xf32>
    %44 = arith.select %41, %39, %43 : vector<8x64xi1>, vector<8x64xf32>
    %c96 = arith.constant 96 : index
    %c0_19 = arith.constant 0 : index
    %45 = vector.load %arg1[%c96, %c0_19] : memref<472x128xf32, #tpu.memory_space<vmem>>, vector<64x64xf32>
    %cst_20 = arith.constant dense<0.000000e+00> : vector<8x64xf32>
    %46 = tpu.matmul %44, %45, %cst_20 {dimension_numbers = #tpu.dot_dimension_numbers<[1], [0], [0], [1], [0, 0, 1, 1], [], []>} : vector<8x64xf32>, vector<64x64xf32>, vector<8x64xf32> -> vector<8x64xf32>
    %c160 = arith.constant 160 : index
    %c0_21 = arith.constant 0 : index
    %47 = vector.load %arg1[%c160, %c0_21] : memref<472x128xf32, #tpu.memory_space<vmem>>, vector<1x64xf32>
    %48 = vector.broadcast %47 : vector<1x64xf32> to vector<8x64xf32>
    %49 = arith.addf %46, %48 : vector<8x64xf32>
    %cst_22 = arith.constant 0.000000e+00 : f32
    %50 = vector.shape_cast %2 : vector<8x1xi1> to vector<8x1xi1>
    %51 = vector.broadcast %50 : vector<8x1xi1> to vector<8x64xi1>
    %52 = vector.broadcast %cst_22 : f32 to vector<8x64xf32>
    %53 = arith.select %51, %49, %52 : vector<8x64xi1>, vector<8x64xf32>
    %cst_23 = arith.constant dense<0.000000e+00> : vector<64xf32>
    %54 = vector.multi_reduction <add>, %53, %cst_23 [0] : vector<8x64xf32> to vector<64xf32>
    %55 = vector.shape_cast %54 : vector<64xf32> to vector<1x64xf32>
    %56 = arith.mulf %53, %53 : vector<8x64xf32>
    %cst_24 = arith.constant dense<0.000000e+00> : vector<64xf32>
    %57 = vector.multi_reduction <add>, %56, %cst_24 [0] : vector<8x64xf32> to vector<64xf32>
    %58 = vector.shape_cast %57 : vector<64xf32> to vector<1x64xf32>
    %c184 = arith.constant 184 : index
    %c0_25 = arith.constant 0 : index
    %59 = vector.load %arg1[%c184, %c0_25] : memref<472x128xf32, #tpu.memory_space<vmem>>, vector<64x64xf32>
    %cst_26 = arith.constant dense<0.000000e+00> : vector<1x64xf32>
    %60 = tpu.matmul %55, %59, %cst_26 {dimension_numbers = #tpu.dot_dimension_numbers<[1], [0], [0], [1], [0, 0, 1, 1], [], []>} : vector<1x64xf32>, vector<64x64xf32>, vector<1x64xf32> -> vector<1x64xf32>
    %c184_27 = arith.constant 184 : index
    %c0_28 = arith.constant 0 : index
    %61 = vector.load %arg1[%c184_27, %c0_28] : memref<472x128xf32, #tpu.memory_space<vmem>>, vector<64x64xf32>
    %cst_29 = arith.constant dense<0.000000e+00> : vector<1x64xf32>
    %62 = tpu.matmul %58, %61, %cst_29 {dimension_numbers = #tpu.dot_dimension_numbers<[1], [0], [0], [1], [0, 0, 1, 1], [], []>} : vector<1x64xf32>, vector<64x64xf32>, vector<1x64xf32> -> vector<1x64xf32>
    %cst_30 = arith.constant 1.250000e-01 : f32
    %63 = vector.broadcast %cst_30 : f32 to vector<1x64xf32>
    %64 = arith.mulf %60, %63 : vector<1x64xf32>
    %cst_31 = arith.constant 1.250000e-01 : f32
    %65 = vector.broadcast %cst_31 : f32 to vector<1x64xf32>
    %66 = arith.mulf %62, %65 : vector<1x64xf32>
    %67 = arith.mulf %64, %64 : vector<1x64xf32>
    %68 = arith.subf %66, %67 : vector<1x64xf32>
    %c168 = arith.constant 168 : index
    %c0_32 = arith.constant 0 : index
    %69 = vector.load %arg1[%c168, %c0_32] : memref<472x128xf32, #tpu.memory_space<vmem>>, vector<1x64xf32>
    %cst_33 = arith.constant 9.99999974E-6 : f32
    %70 = vector.broadcast %cst_33 : f32 to vector<1x64xf32>
    %71 = arith.addf %68, %70 : vector<1x64xf32>
    %72 = math.rsqrt %71 : vector<1x64xf32>
    %73 = arith.mulf %69, %72 : vector<1x64xf32>
    %c176 = arith.constant 176 : index
    %c0_34 = arith.constant 0 : index
    %74 = vector.load %arg1[%c176, %c0_34] : memref<472x128xf32, #tpu.memory_space<vmem>>, vector<1x64xf32>
    %75 = arith.mulf %64, %73 : vector<1x64xf32>
    %76 = arith.subf %74, %75 : vector<1x64xf32>
    %77 = vector.broadcast %73 : vector<1x64xf32> to vector<8x64xf32>
    %78 = arith.mulf %49, %77 : vector<8x64xf32>
    %79 = vector.broadcast %76 : vector<1x64xf32> to vector<8x64xf32>
    %80 = arith.addf %78, %79 : vector<8x64xf32>
    %cst_35 = arith.constant 0.000000e+00 : f32
    %81 = vector.broadcast %cst_35 : f32 to vector<8x64xf32>
    %82 = arith.cmpf oge, %80, %81 : vector<8x64xf32>
    %cst_36 = arith.constant 2.000000e-01 : f32
    %83 = vector.broadcast %cst_36 : f32 to vector<8x64xf32>
    %84 = arith.mulf %83, %80 : vector<8x64xf32>
    %85 = arith.select %82, %80, %84 : vector<8x64xi1>, vector<8x64xf32>
    %c248 = arith.constant 248 : index
    %c0_37 = arith.constant 0 : index
    %86 = vector.load %arg1[%c248, %c0_37] : memref<472x128xf32, #tpu.memory_space<vmem>>, vector<64x64xf32>
    %cst_38 = arith.constant dense<0.000000e+00> : vector<8x64xf32>
    %87 = tpu.matmul %85, %86, %cst_38 {dimension_numbers = #tpu.dot_dimension_numbers<[1], [0], [0], [1], [0, 0, 1, 1], [], []>} : vector<8x64xf32>, vector<64x64xf32>, vector<8x64xf32> -> vector<8x64xf32>
    %c312 = arith.constant 312 : index
    %c0_39 = arith.constant 0 : index
    %88 = vector.load %arg1[%c312, %c0_39] : memref<472x128xf32, #tpu.memory_space<vmem>>, vector<1x64xf32>
    %89 = vector.broadcast %88 : vector<1x64xf32> to vector<8x64xf32>
    %90 = arith.addf %87, %89 : vector<8x64xf32>
    %cst_40 = arith.constant 0.000000e+00 : f32
    %91 = vector.shape_cast %2 : vector<8x1xi1> to vector<8x1xi1>
    %92 = vector.broadcast %91 : vector<8x1xi1> to vector<8x64xi1>
    %93 = vector.broadcast %cst_40 : f32 to vector<8x64xf32>
    %94 = arith.select %92, %90, %93 : vector<8x64xi1>, vector<8x64xf32>
    %cst_41 = arith.constant dense<0.000000e+00> : vector<64xf32>
    %95 = vector.multi_reduction <add>, %94, %cst_41 [0] : vector<8x64xf32> to vector<64xf32>
    %96 = vector.shape_cast %95 : vector<64xf32> to vector<1x64xf32>
    %97 = arith.mulf %94, %94 : vector<8x64xf32>
    %cst_42 = arith.constant dense<0.000000e+00> : vector<64xf32>
    %98 = vector.multi_reduction <add>, %97, %cst_42 [0] : vector<8x64xf32> to vector<64xf32>
    %99 = vector.shape_cast %98 : vector<64xf32> to vector<1x64xf32>
    %c336 = arith.constant 336 : index
    %c0_43 = arith.constant 0 : index
    %100 = vector.load %arg1[%c336, %c0_43] : memref<472x128xf32, #tpu.memory_space<vmem>>, vector<64x64xf32>
    %cst_44 = arith.constant dense<0.000000e+00> : vector<1x64xf32>
    %101 = tpu.matmul %96, %100, %cst_44 {dimension_numbers = #tpu.dot_dimension_numbers<[1], [0], [0], [1], [0, 0, 1, 1], [], []>} : vector<1x64xf32>, vector<64x64xf32>, vector<1x64xf32> -> vector<1x64xf32>
    %c336_45 = arith.constant 336 : index
    %c0_46 = arith.constant 0 : index
    %102 = vector.load %arg1[%c336_45, %c0_46] : memref<472x128xf32, #tpu.memory_space<vmem>>, vector<64x64xf32>
    %cst_47 = arith.constant dense<0.000000e+00> : vector<1x64xf32>
    %103 = tpu.matmul %99, %102, %cst_47 {dimension_numbers = #tpu.dot_dimension_numbers<[1], [0], [0], [1], [0, 0, 1, 1], [], []>} : vector<1x64xf32>, vector<64x64xf32>, vector<1x64xf32> -> vector<1x64xf32>
    %cst_48 = arith.constant 6.250000e-02 : f32
    %104 = vector.broadcast %cst_48 : f32 to vector<1x64xf32>
    %105 = arith.mulf %101, %104 : vector<1x64xf32>
    %cst_49 = arith.constant 6.250000e-02 : f32
    %106 = vector.broadcast %cst_49 : f32 to vector<1x64xf32>
    %107 = arith.mulf %103, %106 : vector<1x64xf32>
    %108 = arith.mulf %105, %105 : vector<1x64xf32>
    %109 = arith.subf %107, %108 : vector<1x64xf32>
    %c320 = arith.constant 320 : index
    %c0_50 = arith.constant 0 : index
    %110 = vector.load %arg1[%c320, %c0_50] : memref<472x128xf32, #tpu.memory_space<vmem>>, vector<1x64xf32>
    %cst_51 = arith.constant 9.99999974E-6 : f32
    %111 = vector.broadcast %cst_51 : f32 to vector<1x64xf32>
    %112 = arith.addf %109, %111 : vector<1x64xf32>
    %113 = math.rsqrt %112 : vector<1x64xf32>
    %114 = arith.mulf %110, %113 : vector<1x64xf32>
    %c328 = arith.constant 328 : index
    %c0_52 = arith.constant 0 : index
    %115 = vector.load %arg1[%c328, %c0_52] : memref<472x128xf32, #tpu.memory_space<vmem>>, vector<1x64xf32>
    %116 = arith.mulf %105, %114 : vector<1x64xf32>
    %117 = arith.subf %115, %116 : vector<1x64xf32>
    %118 = vector.broadcast %114 : vector<1x64xf32> to vector<8x64xf32>
    %119 = arith.mulf %90, %118 : vector<8x64xf32>
    %120 = vector.broadcast %117 : vector<1x64xf32> to vector<8x64xf32>
    %121 = arith.addf %119, %120 : vector<8x64xf32>
    %cst_53 = arith.constant 0.000000e+00 : f32
    %122 = vector.broadcast %cst_53 : f32 to vector<8x64xf32>
    %123 = arith.cmpf oge, %121, %122 : vector<8x64xf32>
    %cst_54 = arith.constant 2.000000e-01 : f32
    %124 = vector.broadcast %cst_54 : f32 to vector<8x64xf32>
    %125 = arith.mulf %124, %121 : vector<8x64xf32>
    %126 = arith.select %123, %121, %125 : vector<8x64xi1>, vector<8x64xf32>
    %c400 = arith.constant 400 : index
    %c0_55 = arith.constant 0 : index
    %127 = vector.load %arg1[%c400, %c0_55] : memref<472x128xf32, #tpu.memory_space<vmem>>, vector<64x48xf32>
    %cst_56 = arith.constant dense<0.000000e+00> : vector<8x48xf32>
    %128 = tpu.matmul %126, %127, %cst_56 {dimension_numbers = #tpu.dot_dimension_numbers<[1], [0], [0], [1], [0, 0, 1, 1], [], []>} : vector<8x64xf32>, vector<64x48xf32>, vector<8x48xf32> -> vector<8x48xf32>
    %c464 = arith.constant 464 : index
    %c0_57 = arith.constant 0 : index
    %129 = vector.load %arg1[%c464, %c0_57] : memref<472x128xf32, #tpu.memory_space<vmem>>, vector<1x48xf32>
    %130 = vector.broadcast %129 : vector<1x48xf32> to vector<8x48xf32>
    %131 = arith.addf %128, %130 : vector<8x48xf32>
    %132 = arith.negf %131 : vector<8x48xf32>
    %133 = math.exp %132 : vector<8x48xf32>
    %cst_58 = arith.constant 1.000000e+00 : f32
    %134 = vector.broadcast %cst_58 : f32 to vector<8x48xf32>
    %135 = arith.addf %134, %133 : vector<8x48xf32>
    %136 = arith.divf %134, %135 : vector<8x48xf32>
    %137 = vector.extract_strided_slice %136 {offsets = [0, 0], sizes = [2, 48], strides = [1, 1]} : vector<8x48xf32> to vector<2x48xf32>
    %c0_59 = arith.constant 0 : index
    %c0_60 = arith.constant 0 : index
    %138 = vector.load %arg2[%c0_59, %c0_60] : memref<2x48xf32, #tpu.memory_space<vmem>>, vector<2x48xf32>
    tpu.vector_store %arg2[%c0_59, %c0_60], %137 {strides = array<i32>} : memref<2x48xf32, #tpu.memory_space<vmem>>, vector<2x48xf32>,
    return
  }
}

</mosaic_0001>

<bundles_post_ra>
// kernel: _impl.1
= control target key start
LH: loop header
LB: loop body
LE: loop exit
PB: predicated region body
PF: predicated region fallthrough
CT: control target
= control target key end

     0   :  { %7 = vsyncpa [#allocation3], 0  ;;  %s1276_s9 = smov [#allocation2]   ;;  %s1439_s0 = inlined_call_operand.vmem [shape: f32[8,8], index: 0, kind: input, shape index: {}]   ;;  %s1440_s1 = inlined_call_operand.hbm [shape: f32[472,128], index: 1, kind: input, shape index: {}]   ;;  %s1441_s2 = inlined_call_operand.vmem [shape: f32[2,48], index: 2, kind: output, shape index: {}]  }
   0x1   :  { %s15_s10 = sshll.u32 %s1276_s9, 4  ;;  %s16_s10 = int_to_ptr.vmem [resolvable:$true] %s15_s10 }
   0x2   :  { %s1262_s11 = scalar_lea.vmem %s16_s10, 7552  ;;  %p1267_p1 = scmp.lt.s32.totalorder %s16_s10, %s16_s10 }
   0x3   :  { %p1263_p0 = scmp.ne.s32.totalorder %s16_s10, %s1262_s11  ;;  %p1268_p2 = scmp.lt.s32.totalorder %s1262_s11, %s1262_s11 }
   0x5   :  { %p1269_p3 = por %p1268_p2, %p1267_p1 }
   0x7   :  { %p1270_p4 = pnand %p1269_p3, %p1263_p0 }
   0x9   :  { %1273 = shalt.err (!%p1270_p4)
}
   0xa   :  { %s1277_s12 = smov 128   ;;  %s1278_s13 = smov 8  }
   0xb   :  { %21 = dma.hbm_to_vmem [thread:$0]  %s1440_s1, 7552, %s16_s10, [#allocation3], %s1277_s12, %s1277_s12, %s1278_s13  }
   0xc   :  { %1274 = dma.done.wait [#allocation3], 7552  }
   0xd   :  { %1275 = vsyncadd [#allocation3], 4294959744  ;;  %v1279_v0 = vmov 0.0   ;;  %vm1280_vm0 = vmmov 0   ;;  %vm35_vm1 = vcmask 64512   ;;  %v29_v1 = vld [vmem:[#allocation2] sm:$0xff]  ;;  %v25_v11 = vlaneseq }
   0xe   :  { %1063 = vmatprep.subr.mxu0 %v1279_v0  ;;  %1065 = vmatprep.mubr.msk.f32.mxu0 %vm1280_vm0, %v1279_v0  ;;  %v28_v2 = vld [vmem:[%s1439_s0] sm:$0xff]  ;;  %v135_v3 = vld [vmem:[#allocation2 + $0x58] sm:$0xff]  ;;  %v134_v4 = vld [vmem:[#allocation2 + $0x50] sm:$0xff]  ;;  %vm112_vm3 = vcmask 523264   ;;  %vm958_vm7 = vcmask 386048  }
   0xf   :  { %1068 = vmatprep.subr.mxu1 %v1279_v0  ;;  %1084 = vmatprep.mubr.msk.f32.mxu1 %vm1280_vm0, %v1279_v0  ;;  %v133_v5 = vld [vmem:[#allocation2 + $0x48] sm:$0xff]  ;;  %v132_v6 = vld [vmem:[#allocation2 + $0x40] sm:$0xff]  ;;  %v131_v7 = vld [vmem:[#allocation2 + $0x38] sm:$0xff]  ;;  %v1327_v12 = vshrl.u32 %v25_v11, 7 }
  0x10   :  { %1064 = vmatpush3.msra.mxu0 %v29_v1  ;;  %1069 = vmatpush3.msra.mxu1 %v135_v3  ;;  %v130_v8 = vld [vmem:[#allocation2 + $0x30] sm:$0xff]  ;;  %v129_v9 = vld [vmem:[#allocation2 + $0x28] sm:$0xff]  ;;  %v128_v10 = vld [vmem:[#allocation2 + $0x20] sm:$0xff] }
  0x11   :  { %1066 = vmatmul.mubr.msk.f32.vlgmr.msra.gmra.mxu0 %vm35_vm1, %v28_v2  ;;  %1087 = vmatprep.subr.mxu0 %v1279_v0  ;;  %v965_v13 = vld [vmem:[#allocation2 + $0x8] ss:$0 sm:$0xff]  ;;  %vm27_vm2 = vcmp.lt.s32.totalorder %v1327_v12, 2  ;;  %v313_v33 = vld [vmem:[#allocation2 + $0x98] sm:$0xff]  ;;  %v312_v34 = vld [vmem:[#allocation2 + $0x90] sm:$0xff]  ;;  %v1352_v51 = vsub.s32 0, %v1327_v12 }
  0x12   :  { %1103 = vmatprep.mubr.msk.f32.mxu0 %vm1280_vm0, %v1279_v0  ;;  %1088 = vmatpush3.msra.mxu0 %v135_v3  ;;  %v311_v35 = vld [vmem:[#allocation2 + $0x88] sm:$0xff]  ;;  %v310_v36 = vld [vmem:[#allocation2 + $0x80] sm:$0xff]  ;;  %v309_v37 = vld [vmem:[#allocation2 + $0x78] sm:$0xff] }
  0x13   :  { %1070 = vmatprep.subr.mxu1 %v1279_v0  ;;  %1089 = vmatprep.subr.mxu0 %v1279_v0  ;;  %v308_v38 = vld [vmem:[#allocation2 + $0x70] sm:$0xff]  ;;  %v307_v39 = vld [vmem:[#allocation2 + $0x68] sm:$0xff]  ;;  %v306_v40 = vld [vmem:[#allocation2 + $0x60] sm:$0xff] }
  0x14   :  { %1071 = vmatpush3.msra.mxu1 %v134_v4  ;;  %1090 = vmatpush3.msra.mxu0 %v134_v4  ;;  %v286_v50 = vld [vmem:[#allocation2 + $0x10] sm:$0x1]  ;;  %v290_v54 = vld [vmem:[#allocation2 + $0x18] sm:$0x1]  ;;  %v414_v1 = vld [vmem:[#allocation2 + $0xe8] sm:$0xff] }
  0x15   :  { %1072 = vmatprep.subr.mxu1 %v1279_v0  ;;  %1091 = vmatprep.subr.mxu0 %v1279_v0  ;;  %v415_v63 = vld [vmem:[#allocation2 + $0xf0] sm:$0xff]  ;;  %v413_v2 = vld [vmem:[#allocation2 + $0xe0] sm:$0xff]  ;;  %v412_v3 = vld [vmem:[#allocation2 + $0xd8] sm:$0xff] }
  0x16   :  { %1073 = vmatpush3.msra.mxu1 %v133_v5  ;;  %1092 = vmatpush3.msra.mxu0 %v133_v5  ;;  %v411_v4 = vld [vmem:[#allocation2 + $0xd0] sm:$0xff]  ;;  %v410_v5 = vld [vmem:[#allocation2 + $0xc8] sm:$0xff] }
  0x17   :  { %1074 = vmatprep.subr.mxu1 %v1279_v0  ;;  %1093 = vmatprep.subr.mxu0 %v1279_v0  ;;  %v873_v12 = vld [vmem:[#allocation2 + $0x1c8] sm:$0xff] }
  0x18   :  { %1075 = vmatpush3.msra.mxu1 %v132_v6  ;;  %1094 = vmatpush3.msra.mxu0 %v132_v6  ;;  %v409_v6 = vld [vmem:[#allocation2 + $0xc0] sm:$0xff] }
  0x19   :  { %1076 = vmatprep.subr.mxu1 %v1279_v0  ;;  %1095 = vmatprep.subr.mxu0 %v1279_v0 }
  0x1a   :  { %1077 = vmatpush3.msra.mxu1 %v131_v7  ;;  %1096 = vmatpush3.msra.mxu0 %v131_v7  ;;  %v408_v7 = vld [vmem:[#allocation2 + $0xb8] sm:$0xff] }
  0x1b   :  { %1078 = vmatprep.subr.mxu1 %v1279_v0  ;;  %1097 = vmatprep.subr.mxu0 %v1279_v0 }
  0x1c   :  { %1079 = vmatpush3.msra.mxu1 %v130_v8  ;;  %1098 = vmatpush3.msra.mxu0 %v130_v8  ;;  %v969_v8 = vld [vmem:[#allocation2 + $0xa0] ss:$0 sm:$0xff] }
  0x1d   :  { %1080 = vmatprep.subr.mxu1 %v1279_v0  ;;  %1099 = vmatprep.subr.mxu0 %v1279_v0 }
  0x1e   :  { %1081 = vmatpush3.msra.mxu1 %v129_v9  ;;  %1100 = vmatpush3.msra.mxu0 %v129_v9 }
  0x1f   :  { %1082 = vmatprep.subr.mxu1 %v1279_v0  ;;  %1101 = vmatprep.subr.mxu0 %v1279_v0 }
  0x20   :  { %1083 = vmatpush3.msra.mxu1 %v128_v10  ;;  %1102 = vmatpush3.msra.mxu0 %v128_v10 }
  0x21   :  { %1106 = vmatprep.subr.mxu1 %v1279_v0  ;;  %1125 = vmatprep.subr.mxu0 %v1279_v0 }
  0xd1   :  { %v105_v14 = vpop.f32.mrf.mxu0 }
  0xd2   :  { %v1330_v15 = vadd.f32 %v965_v13, %v105_v14 }
  0xd3   :  { %v1067_v16 = vpop.f32.mrf.mxu0 }
  0xd4   :  { %v111_v17 = vsel %vm27_vm2, %v1330_v15, 0.0 }
  0xd5   :  { %v113_v18 = vsel %vm112_vm3, %v111_v17, 0.0  ;;  %v120_v19 = vmul.f32 %v111_v17, %v111_v17 }
  0xd6   :  { %v114_v20 = vrot.slane %v113_v18, 4 }
  0xd7   :  { %v121_v21 = vsel %vm112_vm3, %v120_v19, 0.0 }
  0xd8   :  { %v115_v22 = vadd.f32 %v114_v20, %v113_v18  ;;  %v122_v23 = vrot.slane %v121_v21, 4 }
  0xda   :  { %v116_v24 = vrot.slane %v115_v22, 2  ;;  %v123_v25 = vadd.f32 %v122_v23, %v121_v21 }
  0xdc   :  { %v117_v26 = vadd.f32 %v116_v24, %v115_v22  ;;  %v124_v27 = vrot.slane %v123_v25, 2 }
  0xde   :  { %v118_v28 = vrot.slane %v117_v26, 1  ;;  %v125_v29 = vadd.f32 %v124_v27, %v123_v25 }
  0xe0   :  { %v126_v30 = vrot.slane %v125_v29, 1  ;;  %v119_v31 = vadd.f32 %v118_v28, %v117_v26 }
  0xe2   :  { %v127_v32 = vadd.f32 %v126_v30, %v125_v29  ;;  %1085 = vmatmul.mubr.msk.f32.vlgmr.msra.gmra.mxu1 %vm112_vm3, %v119_v31  ;;  %v593_v29 = vld [vmem:[#allocation2 + $0x130] sm:$0xff]  ;;  %v592_v30 = vld [vmem:[#allocation2 + $0x128] sm:$0xff]  ;;  %v591_v31 = vld [vmem:[#allocation2 + $0x120] sm:$0xff] }
  0xe3   :  { %1122 = vmatprep.mubr.msk.f32.mxu1 %vm1280_vm0, %v1279_v0  ;;  %1107 = vmatpush3.msra.mxu1 %v313_v33  ;;  %v589_v33 = vld [vmem:[#allocation2 + $0x110] sm:$0xff] }
  0xe4   :  { %1104 = vmatmul.mubr.msk.f32.vlgmr.msra.gmra.mxu0 %vm112_vm3, %v127_v32  ;;  %1108 = vmatprep.subr.mxu1 %v1279_v0  ;;  %v590_v32 = vld [vmem:[#allocation2 + $0x118] sm:$0xff] }
  0xe5   :  { %1141 = vmatprep.mubr.msk.f32.mxu0 %vm1280_vm0, %v1279_v0  ;;  %1109 = vmatpush3.msra.mxu1 %v312_v34  ;;  %v588_v34 = vld [vmem:[#allocation2 + $0x108] sm:$0xff] }
  0xe6   :  { %1110 = vmatprep.subr.mxu1 %v1279_v0  ;;  %1126 = vmatpush3.msra.mxu0 %v415_v63 }
  0xe7   :  { %1111 = vmatpush3.msra.mxu1 %v311_v35  ;;  %1127 = vmatprep.subr.mxu0 %v1279_v0  ;;  %v587_v35 = vld [vmem:[#allocation2 + $0x100] sm:$0xff] }
  0xe8   :  { %1112 = vmatprep.subr.mxu1 %v1279_v0  ;;  %1128 = vmatpush3.msra.mxu0 %v414_v1 }
  0xe9   :  { %1113 = vmatpush3.msra.mxu1 %v310_v36  ;;  %1129 = vmatprep.subr.mxu0 %v1279_v0  ;;  %v586_v36 = vld [vmem:[#allocation2 + $0xf8] sm:$0xff] }
  0xea   :  { %1114 = vmatprep.subr.mxu1 %v1279_v0  ;;  %1130 = vmatpush3.msra.mxu0 %v413_v2 }
  0xeb   :  { %1115 = vmatpush3.msra.mxu1 %v309_v37  ;;  %1131 = vmatprep.subr.mxu0 %v1279_v0 }
  0xec   :  { %1116 = vmatprep.subr.mxu1 %v1279_v0  ;;  %1132 = vmatpush3.msra.mxu0 %v412_v3 }
  0xed   :  { %1117 = vmatpush3.msra.mxu1 %v308_v38  ;;  %1133 = vmatprep.subr.mxu0 %v1279_v0 }
  0xee   :  { %1118 = vmatprep.subr.mxu1 %v1279_v0  ;;  %1134 = vmatpush3.msra.mxu0 %v411_v4 }
  0xef   :  { %1119 = vmatpush3.msra.mxu1 %v307_v39  ;;  %1135 = vmatprep.subr.mxu0 %v1279_v0 }
  0xf0   :  { %1120 = vmatprep.subr.mxu1 %v1279_v0  ;;  %1136 = vmatpush3.msra.mxu0 %v410_v5 }
  0xf1   :  { %1121 = vmatpush3.msra.mxu1 %v306_v40  ;;  %1137 = vmatprep.subr.mxu0 %v1279_v0 }
  0xf2   :  { %1144 = vmatprep.subr.mxu1 %v1279_v0  ;;  %1138 = vmatpush3.msra.mxu0 %v409_v6 }
  0xf3   :  { %1139 = vmatprep.subr.mxu0 %v1279_v0 }
  0xf4   :  { %1140 = vmatpush3.msra.mxu0 %v408_v7 }
  0xf5   :  { %1163 = vmatprep.subr.mxu0 %v1279_v0 }
 0x1a2   :  { %v205_v41 = vpop.f32.mrf.mxu1 }
 0x1a3   :  { %v282_v42 = vmul.f32 0.25, %v205_v41 }
 0x1a4   :  { %v1086_v43 = vpop.f32.mrf.mxu1  ;;  %v278_v44 = vpop.f32.mrf.mxu0 }
 0x1a5   :  { %v284_v45 = vmul.f32 %v282_v42, %v282_v42  ;;  %v283_v46 = vmul.f32 0.25, %v278_v44 }
 0x1a6   :  { %v1105_v47 = vpop.f32.mrf.mxu0 }
 0x1a7   :  { %v285_v48 = vsub.f32 %v283_v46, %v284_v45  ;;  %v566_v46 = vld [vmem:[#allocation2 + $0xa8] sm:$0x1] }
 0x1a9   :  { %v287_v49 = vadd.f32 1e-05, %v285_v48 }
 0x1ab   :  { %1244 = vrsqrt.f32 %v287_v49  ;;  %v570_v49 = vld [vmem:[#allocation2 + $0xb0] sm:$0x1] }
 0x1b8   :  { %v1245_v52 = vpop.eup %1244 }
 0x1b9   :  { %v289_v53 = vmul.f32 %v1245_v52, %v286_v50 }
 0x1bb   :  { %v291_v55 = vmul.f32 %v289_v53, %v282_v42  ;;  %v296_v56 = vrot.slane %v289_v53, %v1352_v51 }
 0x1bd   :  { %v292_v57 = vsub.f32 %v290_v54, %v291_v55  ;;  %v297_v58 = vmul.f32 %v296_v56, %v1330_v15 }
 0x1bf   :  { %v301_v59 = vrot.slane %v292_v57, %v1352_v51 }
 0x1c1   :  { %v302_v60 = vadd.f32 %v301_v59, %v297_v58  ;;  %v695_v59 = vld [vmem:[#allocation2 + $0x188] sm:$0xff] }
 0x1c3   :  { %vm303_vm4 = vcmp.ge.f32.partialorder %v302_v60, 0.0  ;;  %v304_v61 = vmul.f32 0.2, %v302_v60 }
 0x1c5   :  { %v305_v62 = vsel %vm303_vm4, %v302_v60, %v304_v61  ;;  %v694_v60 = vld [vmem:[#allocation2 + $0x180] sm:$0xff]  ;;  %v693_v61 = vld [vmem:[#allocation2 + $0x178] sm:$0xff] }
 0x1c6   :  { %1123 = vmatmul.mubr.msk.f32.vlgmr.msra.gmra.mxu1 %vm112_vm3, %v305_v62  ;;  %v692_v62 = vld [vmem:[#allocation2 + $0x170] sm:$0xff] }
 0x1c7   :  { %1160 = vmatprep.mubr.msk.f32.mxu1 %vm1280_vm0, %v1279_v0  ;;  %1145 = vmatpush3.msra.mxu1 %v415_v63  ;;  %v691_v63 = vld [vmem:[#allocation2 + $0x168] sm:$0xff] }
 0x1c8   :  { %1146 = vmatprep.subr.mxu1 %v1279_v0 }
 0x1c9   :  { %1147 = vmatpush3.msra.mxu1 %v414_v1  ;;  %v690_v1 = vld [vmem:[#allocation2 + $0x160] sm:$0xff] }
 0x1ca   :  { %1148 = vmatprep.subr.mxu1 %v1279_v0 }
 0x1cb   :  { %1149 = vmatpush3.msra.mxu1 %v413_v2  ;;  %v689_v2 = vld [vmem:[#allocation2 + $0x158] sm:$0xff] }
 0x1cc   :  { %1150 = vmatprep.subr.mxu1 %v1279_v0 }
 0x1cd   :  { %1151 = vmatpush3.msra.mxu1 %v412_v3  ;;  %v688_v3 = vld [vmem:[#allocation2 + $0x150] sm:$0xff] }
 0x1ce   :  { %1152 = vmatprep.subr.mxu1 %v1279_v0 }
 0x1cf   :  { %1153 = vmatpush3.msra.mxu1 %v411_v4  ;;  %v973_v4 = vld [vmem:[#allocation2 + $0x138] ss:$0 sm:$0xff] }
 0x1d0   :  { %1154 = vmatprep.subr.mxu1 %v1279_v0 }
 0x1d1   :  { %1155 = vmatpush3.msra.mxu1 %v410_v5 }
 0x1d2   :  { %1156 = vmatprep.subr.mxu1 %v1279_v0 }
 0x1d3   :  { %1157 = vmatpush3.msra.mxu1 %v409_v6 }
 0x1d4   :  { %1158 = vmatprep.subr.mxu1 %v1279_v0 }
 0x1d5   :  { %1159 = vmatpush3.msra.mxu1 %v408_v7 }
 0x1d6   :  { %1182 = vmatprep.subr.mxu1 %v1279_v0 }
 0x286   :  { %v388_v9 = vpop.f32.mrf.mxu1 }
 0x287   :  { %v1376_v10 = vadd.f32 %v969_v8, %v388_v9 }
 0x288   :  { %v1124_v11 = vpop.f32.mrf.mxu1 }
 0x289   :  { %v392_v13 = vsel %vm27_vm2, %v1376_v10, 0.0 }
 0x28a   :  { %v393_v14 = vsel %vm112_vm3, %v392_v13, 0.0  ;;  %v400_v15 = vmul.f32 %v392_v13, %v392_v13 }
 0x28b   :  { %v394_v16 = vrot.slane %v393_v14, 4 }
 0x28c   :  { %v401_v17 = vsel %vm112_vm3, %v400_v15, 0.0 }
 0x28d   :  { %v395_v18 = vadd.f32 %v394_v16, %v393_v14  ;;  %v402_v19 = vrot.slane %v401_v17, 4 }
 0x28f   :  { %v396_v20 = vrot.slane %v395_v18, 2  ;;  %v403_v21 = vadd.f32 %v402_v19, %v401_v17 }
 0x291   :  { %v397_v22 = vadd.f32 %v396_v20, %v395_v18  ;;  %v404_v23 = vrot.slane %v403_v21, 2 }
 0x293   :  { %v398_v24 = vrot.slane %v397_v22, 1  ;;  %v405_v25 = vadd.f32 %v404_v23, %v403_v21 }
 0x295   :  { %v399_v26 = vadd.f32 %v398_v24, %v397_v22  ;;  %v406_v27 = vrot.slane %v405_v25, 1 }
 0x297   :  { %v407_v28 = vadd.f32 %v406_v27, %v405_v25  ;;  %1142 = vmatmul.mubr.msk.f32.vlgmr.msra.gmra.mxu0 %vm112_vm3, %v399_v26  ;;  %v872_v25 = vld [vmem:[#allocation2 + $0x1c0] sm:$0xff]  ;;  %v871_v26 = vld [vmem:[#allocation2 + $0x1b8] sm:$0xff]  ;;  %v870_v27 = vld [vmem:[#allocation2 + $0x1b0] sm:$0xff] }
 0x298   :  { %1179 = vmatprep.mubr.msk.f32.mxu0 %vm1280_vm0, %v1279_v0  ;;  %1164 = vmatpush3.msra.mxu0 %v593_v29  ;;  %v868_v29 = vld [vmem:[#allocation2 + $0x1a0] sm:$0xff] }
 0x299   :  { %1161 = vmatmul.mubr.msk.f32.vlgmr.msra.gmra.mxu1 %vm112_vm3, %v407_v28  ;;  %1165 = vmatprep.subr.mxu0 %v1279_v0  ;;  %v869_v28 = vld [vmem:[#allocation2 + $0x1a8] sm:$0xff] }
 0x29a   :  { %1198 = vmatprep.mubr.msk.f32.mxu1 %vm1280_vm0, %v1279_v0  ;;  %1166 = vmatpush3.msra.mxu0 %v592_v30  ;;  %v867_v30 = vld [vmem:[#allocation2 + $0x198] sm:$0xff] }
 0x29b   :  { %1167 = vmatprep.subr.mxu0 %v1279_v0  ;;  %1183 = vmatpush3.msra.mxu1 %v695_v59 }
 0x29c   :  { %1168 = vmatpush3.msra.mxu0 %v591_v31  ;;  %1184 = vmatprep.subr.mxu1 %v1279_v0  ;;  %v866_v31 = vld [vmem:[#allocation2 + $0x190] sm:$0xff] }
 0x29d   :  { %1169 = vmatprep.subr.mxu0 %v1279_v0  ;;  %1185 = vmatpush3.msra.mxu1 %v694_v60 }
 0x29e   :  { %1170 = vmatpush3.msra.mxu0 %v590_v32  ;;  %1186 = vmatprep.subr.mxu1 %v1279_v0 }
 0x29f   :  { %1171 = vmatprep.subr.mxu0 %v1279_v0  ;;  %1187 = vmatpush3.msra.mxu1 %v693_v61 }
 0x2a0   :  { %1172 = vmatpush3.msra.mxu0 %v589_v33  ;;  %1188 = vmatprep.subr.mxu1 %v1279_v0 }
 0x2a1   :  { %1173 = vmatprep.subr.mxu0 %v1279_v0  ;;  %1189 = vmatpush3.msra.mxu1 %v692_v62 }
 0x2a2   :  { %1174 = vmatpush3.msra.mxu0 %v588_v34  ;;  %1190 = vmatprep.subr.mxu1 %v1279_v0 }
 0x2a3   :  { %1175 = vmatprep.subr.mxu0 %v1279_v0  ;;  %1191 = vmatpush3.msra.mxu1 %v691_v63 }
 0x2a4   :  { %1176 = vmatpush3.msra.mxu0 %v587_v35  ;;  %1192 = vmatprep.subr.mxu1 %v1279_v0 }
 0x2a5   :  { %1177 = vmatprep.subr.mxu0 %v1279_v0  ;;  %1193 = vmatpush3.msra.mxu1 %v690_v1 }
 0x2a6   :  { %1178 = vmatpush3.msra.mxu0 %v586_v36  ;;  %1194 = vmatprep.subr.mxu1 %v1279_v0 }
 0x2a7   :  { %1201 = vmatprep.subr.mxu0 %v1279_v0  ;;  %1195 = vmatpush3.msra.mxu1 %v689_v2 }
 0x2a8   :  { %1196 = vmatprep.subr.mxu1 %v1279_v0 }
 0x2a9   :  { %1197 = vmatpush3.msra.mxu1 %v688_v3 }
 0x2aa   :  { %1220 = vmatprep.subr.mxu1 %v1279_v0 }
 0x357   :  { %v485_v37 = vpop.f32.mrf.mxu0 }
 0x358   :  { %v562_v38 = vmul.f32 0.125, %v485_v37 }
 0x359   :  { %v1143_v39 = vpop.f32.mrf.mxu0  ;;  %v558_v40 = vpop.f32.mrf.mxu1 }
 0x35a   :  { %v564_v41 = vmul.f32 %v562_v38, %v562_v38  ;;  %v563_v42 = vmul.f32 0.125, %v558_v40 }
 0x35b   :  { %v1162_v43 = vpop.f32.mrf.mxu1 }
 0x35c   :  { %v565_v44 = vsub.f32 %v563_v42, %v564_v41  ;;  %v846_v41 = vld [vmem:[#allocation2 + $0x140] sm:$0x1] }
 0x35e   :  { %v567_v45 = vadd.f32 1e-05, %v565_v44  ;;  %v850_v44 = vld [vmem:[#allocation2 + $0x148] sm:$0x1] }
 0x360   :  { %1246 = vrsqrt.f32 %v567_v45 }
 0x36d   :  { %v1247_v47 = vpop.eup %1246 }
 0x36e   :  { %v569_v48 = vmul.f32 %v1247_v47, %v566_v46 }
 0x370   :  { %v571_v50 = vmul.f32 %v569_v48, %v562_v38  ;;  %v576_v52 = vrot.slane %v569_v48, %v1352_v51 }
 0x372   :  { %v572_v53 = vsub.f32 %v570_v49, %v571_v50  ;;  %v577_v54 = vmul.f32 %v576_v52, %v1376_v10 }
 0x374   :  { %v581_v55 = vrot.slane %v572_v53, %v1352_v51  ;;  %v977_v53 = vld [vmem:[#allocation2 + $0x1d0] ss:$0 sm:$0xff] }
 0x376   :  { %v582_v56 = vadd.f32 %v581_v55, %v577_v54 }
 0x378   :  { %vm583_vm5 = vcmp.ge.f32.partialorder %v582_v56, 0.0  ;;  %v584_v57 = vmul.f32 0.2, %v582_v56 }
 0x37a   :  { %v585_v58 = vsel %vm583_vm5, %v582_v56, %v584_v57 }
 0x37b   :  { %1180 = vmatmul.mubr.msk.f32.vlgmr.msra.gmra.mxu0 %vm112_vm3, %v585_v58 }
 0x37c   :  { %1217 = vmatprep.mubr.msk.f32.mxu0 %vm1280_vm0, %v1279_v0  ;;  %1202 = vmatpush3.msra.mxu0 %v695_v59 }
 0x37d   :  { %1203 = vmatprep.subr.mxu0 %v1279_v0 }
 0x37e   :  { %1204 = vmatpush3.msra.mxu0 %v694_v60 }
 0x37f   :  { %1205 = vmatprep.subr.mxu0 %v1279_v0 }
 0x380   :  { %1206 = vmatpush3.msra.mxu0 %v693_v61 }
 0x381   :  { %1207 = vmatprep.subr.mxu0 %v1279_v0 }
 0x382   :  { %1208 = vmatpush3.msra.mxu0 %v692_v62 }
 0x383   :  { %1209 = vmatprep.subr.mxu0 %v1279_v0 }
 0x384   :  { %1210 = vmatpush3.msra.mxu0 %v691_v63 }
 0x385   :  { %1211 = vmatprep.subr.mxu0 %v1279_v0 }
 0x386   :  { %1212 = vmatpush3.msra.mxu0 %v690_v1 }
 0x387   :  { %1213 = vmatprep.subr.mxu0 %v1279_v0 }
 0x388   :  { %1214 = vmatpush3.msra.mxu0 %v689_v2 }
 0x389   :  { %1215 = vmatprep.subr.mxu0 %v1279_v0 }
 0x38a   :  { %1216 = vmatpush3.msra.mxu0 %v688_v3 }
 0x43b   :  { %v668_v5 = vpop.f32.mrf.mxu0 }
 0x43c   :  { %v669_v6 = vadd.f32 %v973_v4, %v668_v5 }
 0x43d   :  { %v1181_v7 = vpop.f32.mrf.mxu0 }
 0x43e   :  { %v672_v8 = vsel %vm27_vm2, %v669_v6, 0.0 }
 0x43f   :  { %v673_v9 = vsel %vm112_vm3, %v672_v8, 0.0  ;;  %v680_v10 = vmul.f32 %v672_v8, %v672_v8 }
 0x440   :  { %v674_v11 = vrot.slane %v673_v9, 4 }
 0x441   :  { %v681_v13 = vsel %vm112_vm3, %v680_v10, 0.0 }
 0x442   :  { %v675_v14 = vadd.f32 %v674_v11, %v673_v9  ;;  %v682_v15 = vrot.slane %v681_v13, 4 }
 0x444   :  { %v676_v16 = vrot.slane %v675_v14, 2  ;;  %v683_v17 = vadd.f32 %v682_v15, %v681_v13 }
 0x446   :  { %v677_v18 = vadd.f32 %v676_v16, %v675_v14  ;;  %v684_v19 = vrot.slane %v683_v17, 2 }
 0x448   :  { %v678_v20 = vrot.slane %v677_v18, 1  ;;  %v685_v21 = vadd.f32 %v684_v19, %v683_v17 }
 0x44a   :  { %v679_v22 = vadd.f32 %v678_v20, %v677_v18  ;;  %v686_v23 = vrot.slane %v685_v21, 1 }
 0x44c   :  { %v687_v24 = vadd.f32 %v686_v23, %v685_v21  ;;  %1199 = vmatmul.mubr.msk.f32.vlgmr.msra.gmra.mxu1 %vm112_vm3, %v679_v22 }
 0x44d   :  { %1236 = vmatprep.mubr.msk.f32.mxu1 %vm1280_vm0, %v1279_v0  ;;  %1221 = vmatpush3.msra.mxu1 %v873_v12 }
 0x44e   :  { %1218 = vmatmul.mubr.msk.f32.vlgmr.msra.gmra.mxu0 %vm112_vm3, %v687_v24  ;;  %1222 = vmatprep.subr.mxu1 %v1279_v0 }
 0x44f   :  { %1223 = vmatpush3.msra.mxu1 %v872_v25 }
 0x450   :  { %1224 = vmatprep.subr.mxu1 %v1279_v0 }
 0x451   :  { %1225 = vmatpush3.msra.mxu1 %v871_v26 }
 0x452   :  { %1226 = vmatprep.subr.mxu1 %v1279_v0 }
 0x453   :  { %1227 = vmatpush3.msra.mxu1 %v870_v27 }
 0x454   :  { %1228 = vmatprep.subr.mxu1 %v1279_v0 }
 0x455   :  { %1229 = vmatpush3.msra.mxu1 %v869_v28 }
 0x456   :  { %1230 = vmatprep.subr.mxu1 %v1279_v0 }
 0x457   :  { %1231 = vmatpush3.msra.mxu1 %v868_v29 }
 0x458   :  { %1232 = vmatprep.subr.mxu1 %v1279_v0 }
 0x459   :  { %1233 = vmatpush3.msra.mxu1 %v867_v30 }
 0x45a   :  { %1234 = vmatprep.subr.mxu1 %v1279_v0 }
 0x45b   :  { %1235 = vmatpush3.msra.mxu1 %v866_v31 }
 0x50c   :  { %v765_v32 = vpop.f32.mrf.mxu1 }
 0x50d   :  { %v842_v33 = vmul.f32 0.0625, %v765_v32 }
 0x50e   :  { %v1200_v34 = vpop.f32.mrf.mxu1  ;;  %v838_v35 = vpop.f32.mrf.mxu0 }
 0x50f   :  { %v844_v36 = vmul.f32 %v842_v33, %v842_v33  ;;  %v843_v37 = vmul.f32 0.0625, %v838_v35 }
 0x510   :  { %v1219_v38 = vpop.f32.mrf.mxu0 }
 0x511   :  { %v845_v39 = vsub.f32 %v843_v37, %v844_v36 }
 0x513   :  { %v847_v40 = vadd.f32 1e-05, %v845_v39 }
 0x515   :  { %1248 = vrsqrt.f32 %v847_v40 }
 0x522   :  { %v1249_v42 = vpop.eup %1248 }
 0x523   :  { %v849_v43 = vmul.f32 %v1249_v42, %v846_v41 }
 0x525   :  { %v851_v45 = vmul.f32 %v849_v43, %v842_v33  ;;  %v856_v46 = vrot.slane %v849_v43, %v1352_v51 }
 0x527   :  { %v852_v47 = vsub.f32 %v850_v44, %v851_v45  ;;  %v857_v0 = vmul.f32 %v856_v46, %v669_v6 }
 0x529   :  { %v861_v48 = vrot.slane %v852_v47, %v1352_v51 }
 0x52b   :  { %v862_v49 = vadd.f32 %v861_v48, %v857_v0 }
 0x52d   :  { %vm863_vm6 = vcmp.ge.f32.partialorder %v862_v49, 0.0  ;;  %v864_v50 = vmul.f32 0.2, %v862_v49 }
 0x52f   :  { %v865_v52 = vsel %vm863_vm6, %v862_v49, %v864_v50 }
 0x530   :  { %1237 = vmatmul.mubr.msk.f32.vlgmr.msra.gmra.mxu1 %vm112_vm3, %v865_v52 }
 0x5f0   :  { %v948_v54 = vpop.f32.mrf.mxu1 }
 0x5f1   :  { %v949_v55 = vadd.f32 %v977_v53, %v948_v54 }
 0x5f2   :  { %v1238_v56 = vpop.f32.mrf.mxu1 }
 0x5f3   :  { %v979_v57 = vmul.f32 -1.442695, %v949_v55 }
 0x5f5   :  { %1250 = vpow2.f32 %v979_v57 }
 0x602   :  { %v1251_v58 = vpop.eup %1250 }
 0x603   :  { %v955_v59 = vadd.f32 1.0, %v1251_v58 }
 0x605   :  { %1252 = vrcp.f32 %v955_v59 }
 0x612   :  { %v1253_v60 = vpop.eup %1252 }
 0x613   :  { %959 = vst.msk [vmem:[%s1441_s2] sm:$0x3] %vm958_vm7, %v1253_v60 }
 0x614   :  { %964 = vsyncpa [#allocation3], 1 }

</bundles_post_ra>
